<compile_context>
chip_gen: v5e
topology: v5e:2x2
jax: 0.10.0
libtpu: 0.0.40
codegen_flags: <defaults>
</compile_context>

<pallas_src>
import functools

import jax
import jax.numpy as jnp
from jax.experimental import pallas as pl
from jax.experimental.pallas import tpu as pltpu

_EPS = 1e-6  # F.pairwise_distance default eps


def _contrastive_loss_kernel(o1_ref, o2_ref, label_ref, out_ref, acc_ref, *,
                             margin, batch_size, tile_b):
    i = pl.program_id(0)

    @pl.when(i == 0)
    def _():
        acc_ref[...] = jnp.zeros_like(acc_ref)

    # f32 accumulation regardless of the embedding dtype.
    diff = (o1_ref[...].astype(jnp.float32)
            - o2_ref[...].astype(jnp.float32)) + _EPS              # (tile_b, D)
    sq_sum = jnp.sum(diff * diff, axis=-1, keepdims=True)          # (tile_b, 1)
    d = jnp.sqrt(sq_sum)                                           # EUP sqrt (hinge only)
    lbl = label_ref[...].astype(jnp.float32)                       # (tile_b, 1)
    hinge = jnp.maximum(margin - d, 0.0)
    # Similar-pair term uses sq_sum directly (avoids sqrt->square rounding).
    per_row = (1.0 - lbl) * sq_sum + lbl * (hinge * hinge)         # (tile_b, 1)

    # Mask out padded rows of the final partial batch tile (select, so any
    # garbage in the padded region of the block cannot propagate).
    row_ids = jax.lax.broadcasted_iota(jnp.int32, (tile_b, 1), 0) + i * tile_b
    per_row = jnp.where(row_ids < batch_size, per_row, 0.0)

    acc_ref[...] += jnp.sum(per_row, keepdims=True)                # (1, 1)

    @pl.when(i == pl.num_programs(0) - 1)
    def _():
        out_ref[...] = acc_ref[...] * (1.0 / batch_size)


def _pick_tile_b(batch, feat, itemsize):
    """Largest multiple-of-8 row tile keeping one input tile <= ~8 MiB.

    With 2 inputs x 2 pipeline buffers that is <= ~32 MiB of VMEM, safe under
    the scoped default on v5e/v6e and under v7x's smaller 64 MiB physical VMEM.
    """
    budget_bytes = 8 * 1024 * 1024
    rows = budget_bytes // max(1, feat * itemsize)
    rows = int(max(8, min(1024, rows)))
    rows -= rows % 8
    if batch <= rows:
        return batch          # single tile; block == full batch dim is legal
    return rows


def contrastive_loss(output1, output2, label, margin=2.0, tile_b=None):
    """Pallas TPU implementation of ContrastiveLoss.forward."""
    assert output1.shape == output2.shape and output1.ndim == 2
    b, feat = output1.shape
    label2d = label.reshape(b, 1).astype(jnp.float32)

    itemsize = jnp.dtype(output1.dtype).itemsize
    if tile_b is None:
        tile_b = _pick_tile_b(b, feat, itemsize)
    num_tiles = pl.cdiv(b, tile_b)

    kernel = functools.partial(
        _contrastive_loss_kernel,
        margin=float(margin),
        batch_size=float(b),
        tile_b=tile_b,
    )

    cost = pl.CostEstimate(
        flops=5 * b * feat,                       # diff, square, reduce, hinge, blend
        transcendentals=b,                        # one sqrt per row
        bytes_accessed=2 * b * feat * itemsize + b * 4 + 4,
    )

    out = pl.pallas_call(
        kernel,
        out_shape=jax.ShapeDtypeStruct((1, 1), jnp.float32),
        grid_spec=pltpu.PrefetchScalarGridSpec(
            num_scalar_prefetch=0,
            grid=(num_tiles,),
            in_specs=[
                pl.BlockSpec((tile_b, feat), lambda i: (i, 0)),
                pl.BlockSpec((tile_b, feat), lambda i: (i, 0)),
                pl.BlockSpec((tile_b, 1), lambda i: (i, 0)),
            ],
            out_specs=pl.BlockSpec((1, 1), lambda i: (0, 0)),
            scratch_shapes=[pltpu.VMEM((1, 1), jnp.float32)],
        ),
        compiler_params=pltpu.CompilerParams(
            dimension_semantics=("arbitrary",),
        ),
        cost_estimate=cost,
    )(output1, output2, label2d)
    return out[0, 0]


def _reference_loss(output1, output2, label, margin=2.0):
    d = jnp.sqrt(jnp.sum(
        (output1.astype(jnp.float32) - output2.astype(jnp.float32) + _EPS) ** 2,
        axis=-1))
    lbl = label.astype(jnp.float32)
    return jnp.mean((1.0 - lbl) * d**2
                    + lbl * jnp.maximum(margin - d, 0.0) ** 2)


if __name__ == "__main__":
    key = jax.random.PRNGKey(0)

    # Case 1: small siamese embedding batch (matches the module's typical use).
    k1, k2, k3 = jax.random.split(key, 3)
    B, D = 8, 32
    o1 = jax.random.normal(k1, (B, D), dtype=jnp.float32)
    o2 = jax.random.normal(k2, (B, D), dtype=jnp.float32)
    lab = jax.random.bernoulli(k3, 0.5, (B,)).astype(jnp.float32)

    loss = jax.block_until_ready(contrastive_loss(o1, o2, lab, margin=2.0))
    ref = _reference_loss(o1, o2, lab, margin=2.0)
    assert jnp.allclose(loss, ref, rtol=1e-5, atol=1e-5), (loss, ref)

    # Case 2: batch not divisible by the tile -> exercises multi-step grid,
    # scratch accumulation, and partial-tile masking.
    k4, k5, k6 = jax.random.split(k3, 3)
    B2, D2 = 20, 32
    o1b = jax.random.normal(k4, (B2, D2), dtype=jnp.float32)
    o2b = jax.random.normal(k5, (B2, D2), dtype=jnp.float32)
    labb = jax.random.bernoulli(k6, 0.5, (B2,)).astype(jnp.float32)

    loss2 = jax.block_until_ready(
        contrastive_loss(o1b, o2b, labb, margin=2.0, tile_b=8))
    ref2 = _reference_loss(o1b, o2b, labb, margin=2.0)
    assert jnp.allclose(loss2, ref2, rtol=1e-5, atol=1e-5), (loss2, ref2)

    print("KERNEL_OK")
</pallas_src>

<mosaic_0001>
module attributes {stable_mosaic.version = 11 : i64} {
  func.func @_contrastive_loss_kernel(%arg0: i32, %arg1: memref<8x32xf32, #tpu.memory_space<vmem>>, %arg2: memref<8x32xf32, #tpu.memory_space<vmem>>, %arg3: memref<8x1xf32, #tpu.memory_space<vmem>>, %arg4: memref<1x1xf32, #tpu.memory_space<vmem>>, %arg5: memref<1x1xf32, #tpu.memory_space<vmem>>) attributes {dimension_semantics = [#tpu.dimension_semantics<arbitrary>], iteration_bounds = array<i64: 1>, scalar_prefetch = 0 : i64, scratch_operands = 1 : i64, tpu.core_type = #tpu.core_type<tc>, window_params = [{transform_indices = @transform_0, window_bounds = array<i64: 8, 32>}, {transform_indices = @transform_1, window_bounds = array<i64: 8, 32>}, {transform_indices = @transform_2, window_bounds = array<i64: 8, 1>}, {pipeline_mode = #tpu.pipeline_mode<synchronous>, transform_indices = @transform_3, window_bounds = array<i64: 1, 1>}]} {
    %c0_i32 = arith.constant 0 : i32
    %0 = arith.cmpi eq, %arg0, %c0_i32 : i32
    %1 = arith.extui %0 : i1 to i32
    %c0_i32_0 = arith.constant 0 : i32
    %2 = arith.cmpi ne, %1, %c0_i32_0 : i32
    scf.if %2 {
      %cst_19 = arith.constant 0.000000e+00 : f32
      %43 = vector.broadcast %cst_19 : f32 to vector<1x1xf32>
      %c0_20 = arith.constant 0 : index
      %c0_21 = arith.constant 0 : index
      %44 = vector.load %arg5[%c0_20, %c0_21] : memref<1x1xf32, #tpu.memory_space<vmem>>, vector<1x1xf32>
      tpu.vector_store %arg5[%c0_20, %c0_21], %43 {strides = array<i32>} : memref<1x1xf32, #tpu.memory_space<vmem>>, vector<1x1xf32>,
    } else {
    }
    %c0 = arith.constant 0 : index
    %c0_1 = arith.constant 0 : index
    %3 = vector.load %arg1[%c0, %c0_1] : memref<8x32xf32, #tpu.memory_space<vmem>>, vector<8x32xf32>
    %c0_2 = arith.constant 0 : index
    %c0_3 = arith.constant 0 : index
    %4 = vector.load %arg2[%c0_2, %c0_3] : memref<8x32xf32, #tpu.memory_space<vmem>>, vector<8x32xf32>
    %5 = arith.subf %3, %4 : vector<8x32xf32>
    %cst = arith.constant 9.99999997E-7 : f32
    %6 = vector.broadcast %cst : f32 to vector<8x32xf32>
    %7 = arith.addf %5, %6 : vector<8x32xf32>
    %8 = arith.mulf %7, %7 : vector<8x32xf32>
    %cst_4 = arith.constant dense<0.000000e+00> : vector<8xf32>
    %9 = vector.multi_reduction <add>, %8, %cst_4 [1] : vector<8x32xf32> to vector<8xf32>
    %10 = vector.shape_cast %9 : vector<8xf32> to vector<8x1xf32>
    %11 = math.sqrt %10 : vector<8x1xf32>
    %c0_5 = arith.constant 0 : index
    %c0_6 = arith.constant 0 : index
    %12 = vector.load %arg3[%c0_5, %c0_6] : memref<8x1xf32, #tpu.memory_space<vmem>>, vector<8x1xf32>
    %cst_7 = arith.constant 2.000000e+00 : f32
    %13 = vector.broadcast %cst_7 : f32 to vector<8x1xf32>
    %14 = arith.subf %13, %11 : vector<8x1xf32>
    %cst_8 = arith.constant 0.000000e+00 : f32
    %15 = vector.broadcast %cst_8 : f32 to vector<8x1xf32>
    %16 = arith.maximumf %14, %15 : vector<8x1xf32>
    %cst_9 = arith.constant 1.000000e+00 : f32
    %17 = vector.broadcast %cst_9 : f32 to vector<8x1xf32>
    %18 = arith.subf %17, %12 : vector<8x1xf32>
    %19 = arith.mulf %18, %10 : vector<8x1xf32>
    %20 = arith.mulf %16, %16 : vector<8x1xf32>
    %21 = arith.mulf %12, %20 : vector<8x1xf32>
    %22 = arith.addf %19, %21 : vector<8x1xf32>
    %23 = tpu.iota {dimensions = array<i32: 0>} : vector<8x1xi32>
    %c8_i32 = arith.constant 8 : i32
    %24 = arith.muli %arg0, %c8_i32 : i32
    %25 = vector.broadcast %24 : i32 to vector<8x1xi32>
    %26 = arith.addi %23, %25 : vector<8x1xi32>
    %27 = arith.sitofp %26 : vector<8x1xi32> to vector<8x1xf32>
    %cst_10 = arith.constant 8.000000e+00 : f32
    %28 = vector.broadcast %cst_10 : f32 to vector<8x1xf32>
    %29 = arith.cmpf olt, %27, %28 : vector<8x1xf32>
    %cst_11 = arith.constant 0.000000e+00 : f32
    %30 = vector.broadcast %cst_11 : f32 to vector<8x1xf32>
    %31 = arith.select %29, %22, %30 : vector<8x1xi1>, vector<8x1xf32>
    %c0_12 = arith.constant 0 : index
    %c0_13 = arith.constant 0 : index
    %32 = vector.load %arg5[%c0_12, %c0_13] : memref<1x1xf32, #tpu.memory_space<vmem>>, vector<1x1xf32>
    %33 = vector.shape_cast %31 : vector<8x1xf32> to vector<1x8x1xf32>
    %cst_14 = arith.constant dense<0.000000e+00> : vector<1xf32>
    %34 = vector.multi_reduction <add>, %33, %cst_14 [1, 2] : vector<1x8x1xf32> to vector<1xf32>
    %35 = vector.shape_cast %34 : vector<1xf32> to vector<1x1x1xf32>
    %36 = vector.extract %35[0, 0, 0] : f32 from vector<1x1x1xf32>
    %37 = vector.broadcast %36 : f32 to vector<1x1xf32>
    %38 = arith.addf %32, %37 : vector<1x1xf32>
    %c0_15 = arith.constant 0 : index
    %c0_16 = arith.constant 0 : index
    %39 = vector.load %arg5[%c0_15, %c0_16] : memref<1x1xf32, #tpu.memory_space<vmem>>, vector<1x1xf32>
    tpu.vector_store %arg5[%c0_15, %c0_16], %38 {strides = array<i32>} : memref<1x1xf32, #tpu.memory_space<vmem>>, vector<1x1xf32>,
    %c0_i32_17 = arith.constant 0 : i32
    %40 = arith.cmpi eq, %arg0, %c0_i32_17 : i32
    %41 = arith.extui %40 : i1 to i32
    %c0_i32_18 = arith.constant 0 : i32
    %42 = arith.cmpi ne, %41, %c0_i32_18 : i32
    scf.if %42 {
      %c0_19 = arith.constant 0 : index
      %c0_20 = arith.constant 0 : index
      %43 = vector.load %arg5[%c0_19, %c0_20] : memref<1x1xf32, #tpu.memory_space<vmem>>, vector<1x1xf32>
      %cst_21 = arith.constant 1.250000e-01 : f32
      %44 = vector.broadcast %cst_21 : f32 to vector<1x1xf32>
      %45 = arith.mulf %43, %44 : vector<1x1xf32>
      %c0_22 = arith.constant 0 : index
      %c0_23 = arith.constant 0 : index
      %46 = vector.load %arg4[%c0_22, %c0_23] : memref<1x1xf32, #tpu.memory_space<vmem>>, vector<1x1xf32>
      tpu.vector_store %arg4[%c0_22, %c0_23], %45 {strides = array<i32>} : memref<1x1xf32, #tpu.memory_space<vmem>>, vector<1x1xf32>,
    } else {
    }
    return
  }
  func.func @transform_0(%arg0: i32) -> (i32, i32) {
    %c0_i32 = arith.constant 0 : i32
    %c0_i32_0 = arith.constant 0 : i32
    return %arg0, %c0_i32 : i32, i32
  }
  func.func @transform_1(%arg0: i32) -> (i32, i32) {
    %c0_i32 = arith.constant 0 : i32
    %c0_i32_0 = arith.constant 0 : i32
    return %arg0, %c0_i32 : i32, i32
  }
  func.func @transform_2(%arg0: i32) -> (i32, i32) {
    %c0_i32 = arith.constant 0 : i32
    %c0_i32_0 = arith.constant 0 : i32
    return %arg0, %c0_i32 : i32, i32
  }
  func.func @transform_3(%arg0: i32) -> (i32, i32) {
    %c0_i32 = arith.constant 0 : i32
    %c0_i32_0 = arith.constant 0 : i32
    %c0_i32_1 = arith.constant 0 : i32
    return %c0_i32, %c0_i32_0 : i32, i32
  }
}

</mosaic_0001>

<bundles_post_ra>
// kernel: tpu_custom_call.1
= control target key start
LH: loop header
LB: loop body
LE: loop exit
PB: predicated region body
PF: predicated region fallthrough
CT: control target
= control target key end

     0   :  { %8 = vsyncpa [#allocation4], 0  ;;  %s208_s0 = inlined_call_operand.vmem [shape: f32[8,32], index: 0, kind: input, shape index: {}]   ;;  %s209_s1 = inlined_call_operand.hbm [shape: f32[8,32], index: 1, kind: input, shape index: {}]   ;;  %s210_s2 = inlined_call_operand.vmem [shape: f32[8,1], index: 2, kind: input, shape index: {}]   ;;  %s211_s3 = inlined_call_operand.hbm [shape: f32[1,1], index: 3, kind: output, shape index: {}]  }
   0x1   :  { %9 = vsyncpa [#allocation5], 0  ;;  %s17_s14 = sshll.u32 %s209_s1, 4  ;;  %s170_s15 = smov [#allocation3]   ;;  %s18_s14 = int_to_ptr.hbm [resolvable:$true] %s17_s14 }
   0x2   :  { %s19_s16 = sshll.u32 %s170_s15, 4  ;;  %s20_s16 = int_to_ptr.vmem [resolvable:$true] %s19_s16 }
   0x3   :  { %22 = dma.hbm_to_vmem [thread:$0]  %s18_s14, 128, %s20_s16, [#allocation4]  }
   0x4   :  { %166 = dma.done.wait [#allocation4], 128  }
   0x5   :  { %167 = vsyncadd [#allocation4], 4294967168  ;;  %v35_v0 = vld [vmem:[%s208_s0] sm:$0xff]  ;;  %vm40_vm0 = vcmask 261120   ;;  %v64_v13 = vlaneseq  ;;  %vm73_vm4 = vcmask 7168   ;;  %vm33_vm5 = vcmask 0  }
   0x6   :  { %v36_v1 = vld [vmem:[#allocation3] sm:$0xff]  ;;  %v171_v30 = vmov 0.0   ;;  %s172_s19 = smov [#allocation6]   ;;  %s101_s23 = sshll.u32 %s211_s3, 4  ;;  %s102_s23 = int_to_ptr.hbm [resolvable:$true] %s101_s23 }
   0x7   :  { %v37_v2 = vsub.f32 %v35_v0, %v36_v1  ;;  %v56_v18 = vld [vmem:[%s210_s2] sm:$0xff]  ;;  %v65_v19 = vshrl.u32 %v64_v13, 7  ;;  %34 = vst.msk [vmem:[#allocation2] sm:$0x1] %vm33_vm5, %v171_v30  ;;  %s99_s20 = sshll.u32 %s172_s19, 4  ;;  %s100_s20 = int_to_ptr.vmem [resolvable:$true] %s99_s20 }
   0x8   :  { %v59_v22 = vsub.f32 1.0, %v56_v18 }
   0x9   :  { %v38_v3 = vadd.f32 1e-06, %v37_v2  ;;  %v69_v23 = vcvt.s32.f32 %v65_v19 }
   0xb   :  { %v39_v4 = vmul.f32 %v38_v3, %v38_v3  ;;  %vm70_vm3 = vcmp.lt.f32.partialorder %v69_v23, 8.0 }
   0xd   :  { %v41_v5 = vsel %vm40_vm0, %v39_v4, 0.0 }
   0xe   :  { %42 = vadd.xlane.f32.xlu0 %v41_v5  ;;  %v72_v38 = vld [vmem:[#allocation2] sm:$0x1] }
  0x81   :  { %v43_v6 = vpop.xlane.xlu0 %42 }
  0x82   :  { %116 = vrsqrt.f32 %v43_v6  ;;  %vm51_vm1 = vcmp.eq.f32.partialorder %v43_v6, inf  ;;  %v54_v15 = vand.u32 2147483648, %v43_v6  ;;  %vm53_vm2 = vcmp.eq.f32.partialorder %v43_v6, 0.0 }
  0x83   :  { %v60_v25 = vmul.f32 %v59_v22, %v43_v6 }
  0x88   :  { %v117_v7 = vpop.eup %116 }
  0x89   :  { %v45_v8 = vmul.f32 %v117_v7, %v43_v6 }
  0x8b   :  { %v46_v9 = vmul.f32 %v117_v7, %v45_v8 }
  0x8d   :  { %v47_v10 = vmul.f32 0.5, %v46_v9 }
  0x8f   :  { %v48_v11 = vsub.f32 1.5, %v47_v10 }
  0x91   :  { %v49_v12 = vmul.f32 %v117_v7, %v48_v11 }
  0x93   :  { %v50_v14 = vmul.f32 %v49_v12, %v43_v6 }
  0x95   :  { %v52_v16 = vsel %vm51_vm1, %v43_v6, %v50_v14 }
  0x96   :  { %v55_v17 = vsel %vm53_vm2, %v54_v15, %v52_v16 }
  0x97   :  { %v57_v20 = vsub.f32 2.0, %v55_v17 }
  0x99   :  { %v58_v21 = vmax.f32 %v57_v20, 0.0 }
  0x9b   :  { %v61_v24 = vmul.f32 %v58_v21, %v58_v21 }
  0x9d   :  { %v62_v26 = vmul.f32 %v61_v24, %v56_v18 }
  0x9f   :  { %v63_v27 = vadd.f32 %v62_v26, %v60_v25 }
  0xa1   :  { %v71_v28 = vsel %vm70_vm3, %v63_v27, 0.0 }
  0xa2   :  { %v74_v29 = vsel %vm73_vm4, %v71_v28, 0.0 }
  0xa3   :  { %75 = vadd.xlane.f32.xlu0 %v74_v29 }
 0x116   :  { %v76_v31 = vpop.xlane.xlu0 %75 }
 0x117   :  { %v77_v32 = vrot.slane %v76_v31, 4 }
 0x119   :  { %v78_v33 = vadd.f32 %v77_v32, %v76_v31 }
 0x11b   :  { %v79_v34 = vrot.slane %v78_v33, 2 }
 0x11d   :  { %v80_v35 = vadd.f32 %v79_v34, %v78_v33 }
 0x11f   :  { %v81_v36 = vrot.slane %v80_v35, 1 }
 0x121   :  { %v82_v37 = vadd.f32 %v81_v36, %v80_v35 }
 0x123   :  { %111 = vpush %v82_v37 }
 0x154   :  { %s112_s2 = spop %111 }
 0x155   :  { %v84_v39 = vstv %s112_s2 }
 0x156   :  { %v85_v40 = vadd.f32 %v84_v39, %v72_v38 }
 0x158   :  { %87 = vst.msk [vmem:[#allocation2] sm:$0x1] %vm33_vm5, %v85_v40 }
 0x15f   :  { %v91_v41 = vld [vmem:[#allocation2] sm:$0x1] }
 0x160   :  { %v92_v42 = vmul.f32 0.125, %v91_v41 }
 0x162   :  { %93 = vst.msk [vmem:[#allocation6] sm:$0x1] %vm33_vm5, %v92_v42 }
 0x163   :  { %104 = dma.vmem_to_hbm [thread:$0]  %s100_s20, 16, %s102_s23, [#allocation5]  }
 0x164   :  { %168 = dma.done.wait [#allocation5], 16  }
 0x165   :  { %169 = vsyncadd [#allocation5], 4294967280 }
 0x166   :  { %109 = vsyncpa [#allocation4], 1 }
 0x167   :  { %110 = vsyncpa [#allocation5], 1 }

</bundles_post_ra>
